<compile_context>
chip_gen: v6e
topology: v6e:2x2x1
jax: 0.10.0
libtpu: 0.0.40
codegen_flags: <defaults>
</compile_context>

<pallas_src>
import functools

import jax
import jax.numpy as jnp
from jax.experimental import pallas as pl
from jax.experimental.pallas import tpu as pltpu


def _round_up(x, m):
    return ((x + m - 1) // m) * m


def _cdiv(a, b):
    return (a + b - 1) // b


# ---------------------------------------------------------------------------
# Kernel
# ---------------------------------------------------------------------------
def _sgc_kernel(x0_ref, x1_ref, w0_ref, w1_ref, b_ref, o_ref):
    # Fused concat-matmul: [tile, F0] @ [F0, L]  +  [tile, F1] @ [F1, L]  + b
    acc = jnp.dot(x0_ref[...], w0_ref[...], preferred_element_type=jnp.float32)
    acc = acc + jnp.dot(x1_ref[...], w1_ref[...],
                        preferred_element_type=jnp.float32)
    o_ref[...] = (acc + b_ref[...]).astype(o_ref.dtype)


# ---------------------------------------------------------------------------
# Hardware-aware sizing
# ---------------------------------------------------------------------------
@functools.lru_cache(maxsize=1)
def _vmem_capacity_bytes():
    try:
        return int(pltpu.get_tpu_info().vmem_capacity_bytes)
    except Exception:
        return 64 * 1024 * 1024  # conservative: true on every current generation


def _default_vmem_budget(capacity):
    if capacity >= 100 * 1024 * 1024:     # v5e / v6e: 128 MiB physical VMEM
        return 96 * 1024 * 1024
    return 40 * 1024 * 1024               # v7x: 64 MiB physical VMEM


def _auto_row_tile(f0, f1, l, in_bytes, w_bytes, out_bytes,
                   vmem_budget_bytes, weight_buffers):
    """Largest row tile (multiple of 8, <=1024) fitting the VMEM budget.

    Uses physical VMEM footprints (last dim padded to 128 lanes, second-to-last
    to 8 sublanes) and includes the in-kernel f32 accumulator temporaries.
    """
    f0l, f1l, ll = _round_up(f0, 128), _round_up(f1, 128), _round_up(l, 128)
    f0s, f1s = _round_up(f0, 8), _round_up(f1, 8)
    # Constant-index weight + bias blocks (x `weight_buffers`: 1 if the
    # pipeline honors Buffered(1), else the default double buffer).
    fixed = weight_buffers * ((f0s + f1s) * ll * w_bytes + 8 * ll * 4)
    # Per row: double-buffered activation tiles + output tile, plus ~2 live
    # f32 (tile, L) intermediates (dot results / cast-on-store temp).
    per_row = (2 * (f0l + f1l) * in_bytes
               + 2 * ll * out_bytes
               + 2 * ll * 4)
    budget = vmem_budget_bytes - fixed
    tile = budget // per_row if budget > 0 else 8
    return int(max(8, min(1024, (tile // 8) * 8)))


def _pick_row_tile(n, f0, f1, l, in_dtype, w_dtype, out_dtype,
                   vmem_budget_bytes, weight_buffers, row_tile):
    if row_tile is None:
        row_tile = _auto_row_tile(
            f0, f1, l,
            jnp.dtype(in_dtype).itemsize,
            jnp.dtype(w_dtype).itemsize,
            jnp.dtype(out_dtype).itemsize,
            vmem_budget_bytes, weight_buffers)
    tile = max(8, (int(row_tile) // 8) * 8)
    # Keep >= 2 grid steps so dimension_semantics=("parallel",) can shard the
    # row axis across v7x's two TensorCores (harmless on single-TC chips).
    if n > 8:
        tile = min(tile, _round_up(_cdiv(n, 2), 8))
    # Don't pad tiny inputs up to a huge tile.
    tile = min(tile, _round_up(n, 8))
    return tile


# ---------------------------------------------------------------------------
# Wrapper
# ---------------------------------------------------------------------------
def prepare_sgc_params(W, b, f0):
    """Hoisted per-weight-version preparation (do NOT call per forward).

    Splits the Linear weight at the concat boundary and reshapes the bias so
    the forward hot path does no weight-sized HBM copies.
    """
    D, L = W.shape
    if not (0 <= f0 <= D) or b.shape != (L,):
        raise ValueError("inconsistent shapes for SGC parameters")
    w0 = jnp.asarray(W[:f0, :])
    w1 = jnp.asarray(W[f0:, :])
    b2d = b.astype(jnp.float32).reshape(1, L)
    return w0, w1, b2d


def _build_specs(tile, f0, f1, l, single_buffer_consts):
    row_map = lambda i: (i, 0)
    const_map = lambda i: (0, 0)
    if single_buffer_consts:
        # Constant-index operands: a second pipeline buffer is dead weight;
        # single-buffer them and spend the reclaimed VMEM on bigger row tiles.
        const_spec = lambda shape: pl.BlockSpec(
            shape, const_map, pipeline_mode=pl.Buffered(1))
    else:
        const_spec = lambda shape: pl.BlockSpec(shape, const_map)
    in_specs = [
        pl.BlockSpec((tile, f0), row_map),   # x0 row tile
        pl.BlockSpec((tile, f1), row_map),   # x_emb row tile
        const_spec((f0, l)),                 # W[:F0]   (constant)
        const_spec((f1, l)),                 # W[F0:]   (constant)
        const_spec((1, l)),                  # bias     (constant)
    ]
    out_spec = pl.BlockSpec((tile, l), row_map)
    return in_specs, out_spec


# Flipped to False at runtime if this Pallas build rejects Buffered(1); the
# fallback uses the default double-buffered constant operands (still correct).
_SINGLE_BUFFER_CONSTS = True


def sgc_forward(x0, x_emb, params, *, row_tile=None, out_dtype=None,
                vmem_budget_bytes=None):
    """SGC forward: concat(x0, x_emb) @ W + b, with the concat fused in-kernel.

    `params` must come from `prepare_sgc_params(W, b, F0)`.
    For exact f32 parity with the PyTorch Linear when using bf16 params, pass
    out_dtype=jnp.float32 (accumulation is always f32 on the MXU).
    """
    global _SINGLE_BUFFER_CONSTS
    w0, w1, b2d = params

    N, F0 = x0.shape
    N1, F1 = x_emb.shape
    L = w0.shape[1]
    if (N != N1 or w0.shape[0] != F0 or w1.shape[0] != F1
            or w1.shape[1] != L or b2d.shape != (1, L)):
        raise ValueError("inconsistent shapes for SGC forward")

    in_dtype = jnp.promote_types(x0.dtype, x_emb.dtype)
    if x0.dtype != in_dtype:
        x0 = x0.astype(in_dtype)
    if x_emb.dtype != in_dtype:
        x_emb = x_emb.astype(in_dtype)
    if out_dtype is None:
        out_dtype = jnp.promote_types(in_dtype, w0.dtype)

    capacity = _vmem_capacity_bytes()
    if vmem_budget_bytes is None:
        vmem_budget_bytes = _default_vmem_budget(capacity)
    # Clamp below physical VMEM so a v5e/v6e-tuned budget can't break v7x.
    vmem_limit = max(32 * 1024 * 1024,
                     min(int(vmem_budget_bytes) + (16 << 20),
                         capacity - (4 << 20)))

    def run(single_buffer_consts):
        tile = _pick_row_tile(
            N, F0, F1, L, in_dtype, w0.dtype, out_dtype, vmem_budget_bytes,
            weight_buffers=1 if single_buffer_consts else 2,
            row_tile=row_tile)
        in_specs, out_spec = _build_specs(tile, F0, F1, L, single_buffer_consts)
        return pl.pallas_call(
            _sgc_kernel,
            out_shape=jax.ShapeDtypeStruct((N, L), out_dtype),
            grid=(_cdiv(N, tile),),                 # ragged last block masked
            in_specs=in_specs,
            out_specs=out_spec,
            compiler_params=pltpu.CompilerParams(
                dimension_semantics=("parallel",),  # shards rows on v7x's 2 TCs
                vmem_limit_bytes=int(vmem_limit),
            ),
        )(x0, x_emb, w0, w1, b2d)

    if _SINGLE_BUFFER_CONSTS:
        try:
            return run(True)
        except Exception:
            _SINGLE_BUFFER_CONSTS = False
    return run(False)


# ---------------------------------------------------------------------------
# Self-test
# ---------------------------------------------------------------------------
if __name__ == "__main__":
    # Small, deterministic example shapes (ragged N and non-128 L on purpose,
    # to exercise the masked last row block and the unpadded-label output path).
    N = 20          # number of nodes / rows (not a multiple of 8)
    F0 = 16         # raw feature dim (x0)
    F1 = 24         # embedding dim (x_emb)
    num_feats = F0 + F1
    num_labels = 10

    key = jax.random.PRNGKey(0)
    k0, k1, kw, kb = jax.random.split(key, 4)

    x0 = jax.random.normal(k0, (N, F0), dtype=jnp.float32)
    x_emb = jax.random.normal(k1, (N, F1), dtype=jnp.float32)

    # Deterministic "Linear(num_feats, num_labels)" parameter init
    # (uniform, torch-style bound = 1/sqrt(fan_in)).
    bound = 1.0 / float(num_feats) ** 0.5
    W = jax.random.uniform(kw, (num_feats, num_labels),
                           minval=-bound, maxval=bound, dtype=jnp.float32)
    b = jax.random.uniform(kb, (num_labels,),
                           minval=-bound, maxval=bound, dtype=jnp.float32)

    ref = jnp.concatenate([x0, x_emb], axis=-1) @ W + b

    # Weight prep hoisted out of the hot path (once per weight version).
    params = prepare_sgc_params(W, b, F0)

    # f32 path (matches the PyTorch module exactly); auto tile -> 2 grid steps.
    out = jax.block_until_ready(sgc_forward(x0, x_emb, params))
    assert out.shape == (N, num_labels)
    assert out.dtype == jnp.float32
    assert jnp.allclose(out, ref, atol=1e-5, rtol=1e-5)

    # Forced tiny tile: exercises a multi-step grid with a masked ragged tail.
    out_small = jax.block_until_ready(
        sgc_forward(x0, x_emb, params, row_tile=8))
    assert jnp.allclose(out_small, ref, atol=1e-5, rtol=1e-5)

    # bf16 activation/weight path (halves HBM traffic; f32 MXU accumulation).
    params_bf16 = prepare_sgc_params(W.astype(jnp.bfloat16), b, F0)
    out_bf16 = jax.block_until_ready(
        sgc_forward(x0.astype(jnp.bfloat16), x_emb.astype(jnp.bfloat16),
                    params_bf16, out_dtype=jnp.float32))
    assert out_bf16.shape == (N, num_labels)
    assert jnp.allclose(out_bf16, ref, atol=1e-1, rtol=5e-2)

    print("KERNEL_OK")
</pallas_src>

<mosaic_0001>
module attributes {stable_mosaic.version = 11 : i64} {
  func.func @_sgc_kernel(%arg0: i32, %arg1: memref<16x16xf32, #tpu.memory_space<vmem>>, %arg2: memref<16x24xf32, #tpu.memory_space<vmem>>, %arg3: memref<16x10xf32, #tpu.memory_space<vmem>>, %arg4: memref<24x10xf32, #tpu.memory_space<vmem>>, %arg5: memref<1x10xf32, #tpu.memory_space<vmem>>, %arg6: memref<16x10xf32, #tpu.memory_space<vmem>>) attributes {dimension_semantics = [#tpu.dimension_semantics<parallel>], iteration_bounds = array<i64: 2>, scalar_prefetch = 0 : i64, scratch_operands = 0 : i64, tpu.core_type = #tpu.core_type<tc>, window_params = [{transform_indices = @transform_0, window_bounds = array<i64: 16, 16>}, {transform_indices = @transform_1, window_bounds = array<i64: 16, 24>}, {pipeline_mode = #tpu.pipeline_mode<synchronous>, transform_indices = @transform_2, window_bounds = array<i64: 16, 10>}, {pipeline_mode = #tpu.pipeline_mode<synchronous>, transform_indices = @transform_3, window_bounds = array<i64: 24, 10>}, {pipeline_mode = #tpu.pipeline_mode<synchronous>, transform_indices = @transform_4, window_bounds = array<i64: 1, 10>}, {transform_indices = @transform_5, window_bounds = array<i64: 16, 10>}]} {
    %c0 = arith.constant 0 : index
    %c0_0 = arith.constant 0 : index
    %0 = vector.load %arg1[%c0, %c0_0] : memref<16x16xf32, #tpu.memory_space<vmem>>, vector<16x16xf32>
    %c0_1 = arith.constant 0 : index
    %c0_2 = arith.constant 0 : index
    %1 = vector.load %arg3[%c0_1, %c0_2] : memref<16x10xf32, #tpu.memory_space<vmem>>, vector<16x10xf32>
    %cst = arith.constant dense<0.000000e+00> : vector<16x10xf32>
    %2 = tpu.matmul %0, %1, %cst {dimension_numbers = #tpu.dot_dimension_numbers<[1], [0], [0], [1], [0, 0, 1, 1], [], []>} : vector<16x16xf32>, vector<16x10xf32>, vector<16x10xf32> -> vector<16x10xf32>
    %c0_3 = arith.constant 0 : index
    %c0_4 = arith.constant 0 : index
    %3 = vector.load %arg2[%c0_3, %c0_4] : memref<16x24xf32, #tpu.memory_space<vmem>>, vector<16x24xf32>
    %c0_5 = arith.constant 0 : index
    %c0_6 = arith.constant 0 : index
    %4 = vector.load %arg4[%c0_5, %c0_6] : memref<24x10xf32, #tpu.memory_space<vmem>>, vector<24x10xf32>
    %cst_7 = arith.constant dense<0.000000e+00> : vector<16x10xf32>
    %5 = tpu.matmul %3, %4, %cst_7 {dimension_numbers = #tpu.dot_dimension_numbers<[1], [0], [0], [1], [0, 0, 1, 1], [], []>} : vector<16x24xf32>, vector<24x10xf32>, vector<16x10xf32> -> vector<16x10xf32>
    %6 = arith.addf %2, %5 : vector<16x10xf32>
    %c0_8 = arith.constant 0 : index
    %c0_9 = arith.constant 0 : index
    %7 = vector.load %arg5[%c0_8, %c0_9] : memref<1x10xf32, #tpu.memory_space<vmem>>, vector<1x10xf32>
    %8 = vector.broadcast %7 : vector<1x10xf32> to vector<16x10xf32>
    %9 = arith.addf %6, %8 : vector<16x10xf32>
    %c0_10 = arith.constant 0 : index
    %c0_11 = arith.constant 0 : index
    %10 = vector.load %arg6[%c0_10, %c0_11] : memref<16x10xf32, #tpu.memory_space<vmem>>, vector<16x10xf32>
    tpu.vector_store %arg6[%c0_10, %c0_11], %9 {strides = array<i32>} : memref<16x10xf32, #tpu.memory_space<vmem>>, vector<16x10xf32>,
    return
  }
  func.func @transform_0(%arg0: i32) -> (i32, i32) {
    %c0_i32 = arith.constant 0 : i32
    %c0_i32_0 = arith.constant 0 : i32
    return %arg0, %c0_i32 : i32, i32
  }
  func.func @transform_1(%arg0: i32) -> (i32, i32) {
    %c0_i32 = arith.constant 0 : i32
    %c0_i32_0 = arith.constant 0 : i32
    return %arg0, %c0_i32 : i32, i32
  }
  func.func @transform_2(%arg0: i32) -> (i32, i32) {
    %c0_i32 = arith.constant 0 : i32
    %c0_i32_0 = arith.constant 0 : i32
    %c0_i32_1 = arith.constant 0 : i32
    return %c0_i32, %c0_i32_0 : i32, i32
  }
  func.func @transform_3(%arg0: i32) -> (i32, i32) {
    %c0_i32 = arith.constant 0 : i32
    %c0_i32_0 = arith.constant 0 : i32
    %c0_i32_1 = arith.constant 0 : i32
    return %c0_i32, %c0_i32_0 : i32, i32
  }
  func.func @transform_4(%arg0: i32) -> (i32, i32) {
    %c0_i32 = arith.constant 0 : i32
    %c0_i32_0 = arith.constant 0 : i32
    %c0_i32_1 = arith.constant 0 : i32
    return %c0_i32, %c0_i32_0 : i32, i32
  }
  func.func @transform_5(%arg0: i32) -> (i32, i32) {
    %c0_i32 = arith.constant 0 : i32
    %c0_i32_0 = arith.constant 0 : i32
    return %arg0, %c0_i32 : i32, i32
  }
}

module attributes {stable_mosaic.version = 11 : i64} {
  func.func @_sgc_kernel(%arg0: i32, %arg1: memref<16x16xf32, #tpu.memory_space<vmem>>, %arg2: memref<16x24xf32, #tpu.memory_space<vmem>>, %arg3: memref<16x10xf32, #tpu.memory_space<vmem>>, %arg4: memref<24x10xf32, #tpu.memory_space<vmem>>, %arg5: memref<1x10xf32, #tpu.memory_space<vmem>>, %arg6: memref<16x10xf32, #tpu.memory_space<vmem>>) attributes {dimension_semantics = [#tpu.dimension_semantics<parallel>], iteration_bounds = array<i64: 2>, scalar_prefetch = 0 : i64, scratch_operands = 0 : i64, tpu.core_type = #tpu.core_type<tc>, window_params = [{transform_indices = @transform_0, window_bounds = array<i64: 16, 16>}, {transform_indices = @transform_1, window_bounds = array<i64: 16, 24>}, {pipeline_mode = #tpu.pipeline_mode<synchronous>, transform_indices = @transform_2, window_bounds = array<i64: 16, 10>}, {pipeline_mode = #tpu.pipeline_mode<synchronous>, transform_indices = @transform_3, window_bounds = array<i64: 24, 10>}, {pipeline_mode = #tpu.pipeline_mode<synchronous>, transform_indices = @transform_4, window_bounds = array<i64: 1, 10>}, {transform_indices = @transform_5, window_bounds = array<i64: 16, 10>}]} {
    %c0 = arith.constant 0 : index
    %c0_0 = arith.constant 0 : index
    %0 = vector.load %arg1[%c0, %c0_0] : memref<16x16xf32, #tpu.memory_space<vmem>>, vector<16x16xf32>
    %c0_1 = arith.constant 0 : index
    %c0_2 = arith.constant 0 : index
    %1 = vector.load %arg3[%c0_1, %c0_2] : memref<16x10xf32, #tpu.memory_space<vmem>>, vector<16x10xf32>
    %cst = arith.constant dense<0.000000e+00> : vector<16x10xf32>
    %2 = tpu.matmul %0, %1, %cst {dimension_numbers = #tpu.dot_dimension_numbers<[1], [0], [0], [1], [0, 0, 1, 1], [], []>} : vector<16x16xf32>, vector<16x10xf32>, vector<16x10xf32> -> vector<16x10xf32>
    %c0_3 = arith.constant 0 : index
    %c0_4 = arith.constant 0 : index
    %3 = vector.load %arg2[%c0_3, %c0_4] : memref<16x24xf32, #tpu.memory_space<vmem>>, vector<16x24xf32>
    %c0_5 = arith.constant 0 : index
    %c0_6 = arith.constant 0 : index
    %4 = vector.load %arg4[%c0_5, %c0_6] : memref<24x10xf32, #tpu.memory_space<vmem>>, vector<24x10xf32>
    %cst_7 = arith.constant dense<0.000000e+00> : vector<16x10xf32>
    %5 = tpu.matmul %3, %4, %cst_7 {dimension_numbers = #tpu.dot_dimension_numbers<[1], [0], [0], [1], [0, 0, 1, 1], [], []>} : vector<16x24xf32>, vector<24x10xf32>, vector<16x10xf32> -> vector<16x10xf32>
    %6 = arith.addf %2, %5 : vector<16x10xf32>
    %c0_8 = arith.constant 0 : index
    %c0_9 = arith.constant 0 : index
    %7 = vector.load %arg5[%c0_8, %c0_9] : memref<1x10xf32, #tpu.memory_space<vmem>>, vector<1x10xf32>
    %8 = vector.broadcast %7 : vector<1x10xf32> to vector<16x10xf32>
    %9 = arith.addf %6, %8 : vector<16x10xf32>
    %c0_10 = arith.constant 0 : index
    %c0_11 = arith.constant 0 : index
    %10 = vector.load %arg6[%c0_10, %c0_11] : memref<16x10xf32, #tpu.memory_space<vmem>>, vector<16x10xf32>
    tpu.vector_store %arg6[%c0_10, %c0_11], %9 {strides = array<i32>} : memref<16x10xf32, #tpu.memory_space<vmem>>, vector<16x10xf32>,
    return
  }
  func.func @transform_0(%arg0: i32) -> (i32, i32) {
    %c0_i32 = arith.constant 0 : i32
    %c0_i32_0 = arith.constant 0 : i32
    return %arg0, %c0_i32 : i32, i32
  }
  func.func @transform_1(%arg0: i32) -> (i32, i32) {
    %c0_i32 = arith.constant 0 : i32
    %c0_i32_0 = arith.constant 0 : i32
    return %arg0, %c0_i32 : i32, i32
  }
  func.func @transform_2(%arg0: i32) -> (i32, i32) {
    %c0_i32 = arith.constant 0 : i32
    %c0_i32_0 = arith.constant 0 : i32
    %c0_i32_1 = arith.constant 0 : i32
    return %c0_i32, %c0_i32_0 : i32, i32
  }
  func.func @transform_3(%arg0: i32) -> (i32, i32) {
    %c0_i32 = arith.constant 0 : i32
    %c0_i32_0 = arith.constant 0 : i32
    %c0_i32_1 = arith.constant 0 : i32
    return %c0_i32, %c0_i32_0 : i32, i32
  }
  func.func @transform_4(%arg0: i32) -> (i32, i32) {
    %c0_i32 = arith.constant 0 : i32
    %c0_i32_0 = arith.constant 0 : i32
    %c0_i32_1 = arith.constant 0 : i32
    return %c0_i32, %c0_i32_0 : i32, i32
  }
  func.func @transform_5(%arg0: i32) -> (i32, i32) {
    %c0_i32 = arith.constant 0 : i32
    %c0_i32_0 = arith.constant 0 : i32
    return %arg0, %c0_i32 : i32, i32
  }
}

</mosaic_0001>

<bundles_post_ra>
// kernel: tpu_custom_call.1
= control target key start
LH: loop header
LB: loop body
LE: loop exit
PB: predicated region body
PF: predicated region fallthrough
CT: control target
= control target key end

     0   :  { %s970_s18 = smov 0   ;;  %s972_s19 = smov 0   ;;  %s1074_s0 = inlined_call_operand.vmem [shape: f32[20,16], index: 0, kind: input, shape index: {}]   ;;  %s1075_s1 = inlined_call_operand.vmem [shape: f32[20,24], index: 1, kind: input, shape index: {}]   ;;  %s1076_s2 = inlined_call_operand.vmem [shape: f32[16,10], index: 2, kind: input, shape index: {}]   ;;  %s1077_s3 = inlined_call_operand.vmem [shape: f32[24,10], index: 3, kind: input, shape index: {}]   ;;  %s1078_s4 = inlined_call_operand.vmem [shape: f32[1,10], index: 4, kind: input, shape index: {}]   ;;  %s1079_s5 = inlined_call_operand.vmem [shape: f32[20,10], index: 5, kind: output, shape index: {}]  }
   0x1   :  { %s974_s20 = smov 0  }
   0x2 LB: > { %s983_s21 = sadd.s32 4294967295, %s906_s20   ;;  %s985_s22 = sadd.s32 1, %s906_s20   ;;  %s906_s20 = sphi %s974_s20, %s1083_s20   ;;  %s902_s19 = sphi %s972_s19, %s1082_s19   ;;  %s898_s18 = sphi %s970_s18, %s1081_s18  }
   0x3   : > { %s134_s23 = ssub.s32 %s906_s20, %s985_s22  ;;  %s137_s24 = sadd.s32 1, %s902_s19 }
   0x4   : > { %p135_p0 = scmp.eq.s32.totalorder %s134_s23, 0  ;;  %p147_p1 = scmp.ne.s32.totalorder %s902_s19, %s898_s18 }
   0x5   : > { %p148_p2 = scmp.eq.s32.totalorder %s983_s21, 1  ;;  %p708_p3 = scmp.ge.s32.totalorder %s906_s20, 1 }
   0x6   : > { %s993_s25 = scalar_select %p135_p0, %s902_s19, %s137_s24  }
   0x7   : > { %p995_p4 = por %p148_p2, %p147_p1  ;;  %p215_p5 = scmp.lt.s32.totalorder %s906_s20, 3 }
   0x9   : > { %p216_p6 = pnand %p708_p3, %p215_p5 }
   0xa   : > { %s1009_s8 = sshll.u32 (!%p216_p6), %s983_s21, 1  ;;  %s252_s27 = sand.u32 (!%p216_p6), 1, %s898_s18  }
   0xb   : > { %219 = sbr.rel (%p216_p6) target bundleno = 263 (0x107), region = 40  ;;  %p260_p7 = scmp.lt.s32.totalorder (!%p216_p6), %s1009_s8, 2 }
   0xc   : > { %s709_s28 = sshll.u32 (!%p216_p6), %s252_s27, 4 }
   0xd   : > { %s1029_s6 = scalar_lea.vmem (!%p216_p6), [#allocation2], %s709_s28  }
  0x10   : > { %v296_v0 = vld [vmem:[%s1077_s3 + $0x10] sm:$0xff]  ;;  %v295_v1 = vld [vmem:[%s1077_s3 + $0x8] sm:$0xff]  ;;  %v290_v3 = vld [vmem:[%s1076_s2] sm:$0xff]  ;;  %s261_s13 = scalar_select %p260_p7, %s1009_s8, 2  ;;  %vm297_vm0 = vcmask 195584   ;;  %vm379_vm1 = vcmask 130048  }
  0x11   : > { %v291_v2 = vld [vmem:[%s1076_s2 + $0x8] sm:$0xff]  ;;  %748 = vmatprep.subr.mxu0 %v296_v0  ;;  %v294_v4 = vld [vmem:[%s1077_s3] sm:$0xff]  ;;  %vm470_vm2 = vcmask 80896   ;;  %s481_s18 = ssub.s32 (%p995_p4), 3, %s1009_s8  ;;  %s736_s7 = sshll.u32 (%p995_p4), %s983_s21, 4 }
  0x12   : > { %757 = vmatprep.subr.mxu1 %v291_v2  ;;  %749 = vmatpush3.msra.mxu0 %v296_v0  ;;  %s711_s14 = sshll.u32 %s261_s13, 3  ;;  %v718_v11 = vld [vmem:[%s1078_s4] ss:$0 sm:$0xff]  ;;  %p482_p8 = scmp.lt.s32.totalorder (%p995_p4), %s481_s18, 2 }
  0x13   : > { %758 = vmatpush3.msra.mxu1 %v291_v2  ;;  %750 = vmatprep.subr.mxu0 %v295_v1  ;;  %s277_s17 = scalar_lea.vmem %s1075_s1, %s711_s14  ;;  %s263_s24 = scalar_lea.vmem %s1074_s0, %s711_s14 }
  0x14   : > { %759 = vmatprep.subr.mxu1 %v290_v3  ;;  %751 = vmatpush3.msra.mxu0 %v295_v1  ;;  %v292_v5 = vld [vmem:[%s277_s17] sm:$0xff]  ;;  %v293_v6 = vld [vmem:[%s277_s17 + $0x8] sm:$0xff]  ;;  %s1040_s11 = scalar_lea.vmem (%p995_p4), %s1079_s5, %s736_s7  }
  0x15   : > { %760 = vmatpush3.msra.mxu1 %v290_v3  ;;  %752 = vmatprep.subr.mxu0 %v294_v4  ;;  %v288_v7 = vld [vmem:[%s263_s24] sm:$0xff]  ;;  %v289_v8 = vld [vmem:[%s263_s24 + $0x8] sm:$0xff] }
  0x16   : > { %753 = vmatpush3.msra.mxu0 %v294_v4  ;;  %754 = vmatprep.mubr.msk.f32.mxu0 %vm297_vm0, %v292_v5 }
  0x17   : > { %761 = vmatprep.mubr.msk.f32.mxu1 %vm379_vm1, %v288_v7  ;;  %755 = vmatmul.mubr.msk.f32.vlgmr.msra.gmra.mxu0 %vm297_vm0, %v293_v6 }
  0x18   : > { %762 = vmatmul.mubr.msk.f32.vlgmr.msra.gmra.mxu1 %vm379_vm1, %v289_v8 }
  0xd7   : > { %v756_v9 = vpop.f32.mrf.mxu0 }
  0xd8   : > { %v763_v10 = vpop.f32.mrf.mxu1 }
  0xd9   : > { %v458_v12 = vadd.f32 %v763_v10, %v756_v9  ;;  %v370_v13 = vpop.f32.mrf.mxu0 }
  0xda   : > { %v452_v14 = vpop.f32.mrf.mxu1 }
  0xdb   : > { %v469_v15 = vadd.f32 %v718_v11, %v458_v12  ;;  %v453_v16 = vadd.f32 %v452_v14, %v370_v13  ;;  %479 = sbr.rel (!%p995_p4) target bundleno = 263 (0x107), region = 44 }
  0xdd   : > { %472 = vst.msk [vmem:[%s1029_s6 + $0x8] sm:$0xff] %vm470_vm2, %v469_v15  ;;  %v468_v17 = vadd.f32 %v718_v11, %v453_v16 }
  0xdf   : > { %471 = vst.msk [vmem:[%s1029_s6] sm:$0xff] %vm470_vm2, %v468_v17 }
  0xe0   : > { %s1085_s18 = smov (!%p482_p8, %s481_s18), 2 }
  0xe1   : > { %s721_s12 = sshll.u32 %s1085_s18, 7 }
  0xe2   : > { %p724_p9 = scmp.eq.s32.totalorder %s721_s12, 0 }
  0xe3   : > { %s1046_s13 = sshrl.u32 (!%p724_p9), %s1085_s18, 1 }
  0xe4   : > { %490 = sbr.rel (%p724_p9) target bundleno = 263 (0x107), region = 48  ;;  %p725_p10 = scmp.le.s32.totalorder (!%p724_p9), %s1046_s13, 0 }
  0xe9   : > { %655 = sbr.rel (%p725_p10) target bundleno = 246 (0xf6), region = 127  ;;  %s908_s21 = smov (!%p725_p10), %s1040_s11  }
  0xea   : > { %s912_s26 = smov (!%p725_p10), %s1029_s6   ;;  %s916_s8 = smov (!%p725_p10), 0  }
  0xeb   : > { %s920_s14 = smov (!%p725_p10), 0  }
  0xee LB: >> { %v555_v18 = vld [vmem:[%s914_s26] sm:$0xff]  ;;  %v557_v19 = vld [vmem:[%s914_s26 + $0x8] sm:$0xff]  ;;  %s559_s15 = sadd.s32 1, %s918_s8  ;;  %s549_s14 = sadd.s32 1, %s922_s14   ;;  %s922_s14 = sphi %s920_s14, %s549_s14   ;;  %s918_s8 = sphi %s916_s8, %s917_s8   ;;  %s914_s26 = sphi %s912_s26, %s564_s26   ;;  %s910_s21 = sphi %s908_s21, %s565_s21  }
  0xef   : >> { %556 = vst [vmem:[%s910_s21] sm:$0xff] %v555_v18  ;;  %558 = vst [vmem:[%s910_s21 + $0x8] sm:$0xff] %v557_v19  ;;  %p560_p11 = scmp.ge.s32.totalorder %s559_s15, %s1046_s13  ;;  %p548_p12 = scmp.ge.s32.totalorder %s549_s14, %s1046_s13 }
  0xf1   : >> { %s1087_s15 = smov (%p560_p11, %s559_s15), 0  ;;  %551 = sbr.rel (!%p548_p12) target bundleno = 238 (0xee), region = 133 }
  0xf2   : >> { %s726_s16 = sshll.u32 %s1087_s15, 4  ;;  %s917_s8 = smov %s1087_s15  }
  0xf3   : >> { %s564_s26 = scalar_lea.vmem %s1029_s6, %s726_s16 [#allocation2]   ;;  %s565_s21 = scalar_lea.vmem %s1040_s11, %s726_s16  }
  0xf6 PF: > { %s1056_s17 = sand.u32 1, %s1085_s18   ;;  %s737_s20 = sshll.u32 %s1046_s13, 4 }
  0xf7   : > { %s570_s23 = scalar_lea.vmem %s1029_s6, %s737_s20 [#allocation2]   ;;  %s572_s24 = scalar_lea.vmem %s1040_s11, %s737_s20  }
  0xf8   : > { %p731_p13 = scmp.le.s32.totalorder %s1056_s17, 0 }
  0xf9   : > { %s924_s27 = smov (!%p731_p13), %s572_s24   ;;  %s928_s28 = smov (!%p731_p13), %s570_s23  }
  0xfa   : > { %669 = sbr.rel (%p731_p13) target bundleno = 263 (0x107), region = 138  ;;  %s932_s29 = smov (!%p731_p13), 0  }
  0xfb   : > { %s936_s30 = smov (!%p731_p13), 0  }
  0xff LB: >> { %v582_v20 = vld [vmem:[%s930_s28] sm:$0xff]  ;;  %s584_s18 = sadd.s32 1, %s934_s29  ;;  %s576_s30 = sadd.s32 1, %s938_s30   ;;  %s938_s30 = sphi %s936_s30, %s576_s30   ;;  %s934_s29 = sphi %s932_s29, %s933_s29   ;;  %s930_s28 = sphi %s928_s28, %s589_s28   ;;  %s926_s27 = sphi %s924_s27, %s590_s27  }
 0x100   : >> { %583 = vst [vmem:[%s926_s27] sm:$0xff] %v582_v20  ;;  %p585_p0 = scmp.ge.s32.totalorder %s584_s18, %s1056_s17  ;;  %p575_p1 = scmp.ge.s32.totalorder %s576_s30, %s1056_s17 }
 0x102   : >> { %s1089_s18 = smov (%p585_p0, %s584_s18), 0  ;;  %578 = sbr.rel (!%p575_p1) target bundleno = 255 (0xff), region = 144 }
 0x103   : >> { %s732_s6 = sshll.u32 %s1089_s18, 3  ;;  %s933_s29 = smov %s1089_s18  }
 0x104   : >> { %s589_s28 = scalar_lea.vmem %s570_s23, %s732_s6 [#allocation2]   ;;  %s590_s27 = scalar_lea.vmem %s572_s24, %s732_s6  }
 0x107 PF: > { %p12_p2 = scmp.ge.s32.totalorder %s985_s22, 4   ;;  %s1081_s18 = smov %s902_s19 }
 0x108   : > { %s1082_s19 = smov %s993_s25  ;;  %s1083_s20 = smov %s985_s22 }
 0x109   :  { %14 = sbr.rel (!%p12_p2) target bundleno = 2 (0x2), region = 155 }

// kernel: tpu_custom_call.1
= control target key start
LH: loop header
LB: loop body
LE: loop exit
PB: predicated region body
PF: predicated region fallthrough
CT: control target
= control target key end

     0   :  { %s970_s18 = smov 0   ;;  %s972_s19 = smov 0   ;;  %s1074_s0 = inlined_call_operand.vmem [shape: f32[20,16], index: 0, kind: input, shape index: {}]   ;;  %s1075_s1 = inlined_call_operand.vmem [shape: f32[20,24], index: 1, kind: input, shape index: {}]   ;;  %s1076_s2 = inlined_call_operand.vmem [shape: f32[16,10], index: 2, kind: input, shape index: {}]   ;;  %s1077_s3 = inlined_call_operand.vmem [shape: f32[24,10], index: 3, kind: input, shape index: {}]   ;;  %s1078_s4 = inlined_call_operand.vmem [shape: f32[1,10], index: 4, kind: input, shape index: {}]   ;;  %s1079_s5 = inlined_call_operand.vmem [shape: f32[20,10], index: 5, kind: output, shape index: {}]  }
   0x1   :  { %s974_s20 = smov 0  }
   0x2 LB: > { %s983_s21 = sadd.s32 4294967295, %s906_s20   ;;  %s985_s22 = sadd.s32 1, %s906_s20   ;;  %s906_s20 = sphi %s974_s20, %s1083_s20   ;;  %s902_s19 = sphi %s972_s19, %s1082_s19   ;;  %s898_s18 = sphi %s970_s18, %s1081_s18  }
   0x3   : > { %s134_s23 = ssub.s32 %s906_s20, %s985_s22  ;;  %s137_s24 = sadd.s32 1, %s902_s19 }
   0x4   : > { %p135_p0 = scmp.eq.s32.totalorder %s134_s23, 0  ;;  %p147_p1 = scmp.ne.s32.totalorder %s902_s19, %s898_s18 }
   0x5   : > { %p148_p2 = scmp.eq.s32.totalorder %s983_s21, 1  ;;  %p708_p3 = scmp.ge.s32.totalorder %s906_s20, 1 }
   0x6   : > { %s993_s25 = scalar_select %p135_p0, %s902_s19, %s137_s24  }
   0x7   : > { %p995_p4 = por %p148_p2, %p147_p1  ;;  %p215_p5 = scmp.lt.s32.totalorder %s906_s20, 3 }
   0x9   : > { %p216_p6 = pnand %p708_p3, %p215_p5 }
   0xa   : > { %s1009_s8 = sshll.u32 (!%p216_p6), %s983_s21, 1  ;;  %s252_s27 = sand.u32 (!%p216_p6), 1, %s898_s18  }
   0xb   : > { %219 = sbr.rel (%p216_p6) target bundleno = 263 (0x107), region = 40  ;;  %p260_p7 = scmp.lt.s32.totalorder (!%p216_p6), %s1009_s8, 2 }
   0xc   : > { %s709_s28 = sshll.u32 (!%p216_p6), %s252_s27, 4 }
   0xd   : > { %s1029_s6 = scalar_lea.vmem (!%p216_p6), [#allocation2], %s709_s28  }
  0x10   : > { %v296_v0 = vld [vmem:[%s1077_s3 + $0x10] sm:$0xff]  ;;  %v295_v1 = vld [vmem:[%s1077_s3 + $0x8] sm:$0xff]  ;;  %v290_v3 = vld [vmem:[%s1076_s2] sm:$0xff]  ;;  %s261_s13 = scalar_select %p260_p7, %s1009_s8, 2  ;;  %vm297_vm0 = vcmask 195584   ;;  %vm379_vm1 = vcmask 130048  }
  0x11   : > { %v291_v2 = vld [vmem:[%s1076_s2 + $0x8] sm:$0xff]  ;;  %748 = vmatprep.subr.mxu0 %v296_v0  ;;  %v294_v4 = vld [vmem:[%s1077_s3] sm:$0xff]  ;;  %vm470_vm2 = vcmask 80896   ;;  %s481_s18 = ssub.s32 (%p995_p4), 3, %s1009_s8  ;;  %s736_s7 = sshll.u32 (%p995_p4), %s983_s21, 4 }
  0x12   : > { %757 = vmatprep.subr.mxu1 %v291_v2  ;;  %749 = vmatpush3.msra.mxu0 %v296_v0  ;;  %s711_s14 = sshll.u32 %s261_s13, 3  ;;  %v718_v11 = vld [vmem:[%s1078_s4] ss:$0 sm:$0xff]  ;;  %p482_p8 = scmp.lt.s32.totalorder (%p995_p4), %s481_s18, 2 }
  0x13   : > { %758 = vmatpush3.msra.mxu1 %v291_v2  ;;  %750 = vmatprep.subr.mxu0 %v295_v1  ;;  %s277_s17 = scalar_lea.vmem %s1075_s1, %s711_s14  ;;  %s263_s24 = scalar_lea.vmem %s1074_s0, %s711_s14 }
  0x14   : > { %759 = vmatprep.subr.mxu1 %v290_v3  ;;  %751 = vmatpush3.msra.mxu0 %v295_v1  ;;  %v292_v5 = vld [vmem:[%s277_s17] sm:$0xff]  ;;  %v293_v6 = vld [vmem:[%s277_s17 + $0x8] sm:$0xff]  ;;  %s1040_s11 = scalar_lea.vmem (%p995_p4), %s1079_s5, %s736_s7  }
  0x15   : > { %760 = vmatpush3.msra.mxu1 %v290_v3  ;;  %752 = vmatprep.subr.mxu0 %v294_v4  ;;  %v288_v7 = vld [vmem:[%s263_s24] sm:$0xff]  ;;  %v289_v8 = vld [vmem:[%s263_s24 + $0x8] sm:$0xff] }
  0x16   : > { %753 = vmatpush3.msra.mxu0 %v294_v4  ;;  %754 = vmatprep.mubr.msk.f32.mxu0 %vm297_vm0, %v292_v5 }
  0x17   : > { %761 = vmatprep.mubr.msk.f32.mxu1 %vm379_vm1, %v288_v7  ;;  %755 = vmatmul.mubr.msk.f32.vlgmr.msra.gmra.mxu0 %vm297_vm0, %v293_v6 }
  0x18   : > { %762 = vmatmul.mubr.msk.f32.vlgmr.msra.gmra.mxu1 %vm379_vm1, %v289_v8 }
  0xd7   : > { %v756_v9 = vpop.f32.mrf.mxu0 }
  0xd8   : > { %v763_v10 = vpop.f32.mrf.mxu1 }
  0xd9   : > { %v458_v12 = vadd.f32 %v763_v10, %v756_v9  ;;  %v370_v13 = vpop.f32.mrf.mxu0 }
  0xda   : > { %v452_v14 = vpop.f32.mrf.mxu1 }
  0xdb   : > { %v469_v15 = vadd.f32 %v718_v11, %v458_v12  ;;  %v453_v16 = vadd.f32 %v452_v14, %v370_v13  ;;  %479 = sbr.rel (!%p995_p4) target bundleno = 263 (0x107), region = 44 }
  0xdd   : > { %472 = vst.msk [vmem:[%s1029_s6 + $0x8] sm:$0xff] %vm470_vm2, %v469_v15  ;;  %v468_v17 = vadd.f32 %v718_v11, %v453_v16 }
  0xdf   : > { %471 = vst.msk [vmem:[%s1029_s6] sm:$0xff] %vm470_vm2, %v468_v17 }
  0xe0   : > { %s1085_s18 = smov (!%p482_p8, %s481_s18), 2 }
  0xe1   : > { %s721_s12 = sshll.u32 %s1085_s18, 7 }
  0xe2   : > { %p724_p9 = scmp.eq.s32.totalorder %s721_s12, 0 }
  0xe3   : > { %s1046_s13 = sshrl.u32 (!%p724_p9), %s1085_s18, 1 }
  0xe4   : > { %490 = sbr.rel (%p724_p9) target bundleno = 263 (0x107), region = 48  ;;  %p725_p10 = scmp.le.s32.totalorder (!%p724_p9), %s1046_s13, 0 }
  0xe9   : > { %655 = sbr.rel (%p725_p10) target bundleno = 246 (0xf6), region = 127  ;;  %s908_s21 = smov (!%p725_p10), %s1040_s11  }
  0xea   : > { %s912_s26 = smov (!%p725_p10), %s1029_s6   ;;  %s916_s8 = smov (!%p725_p10), 0  }
  0xeb   : > { %s920_s14 = smov (!%p725_p10), 0  }
  0xee LB: >> { %v555_v18 = vld [vmem:[%s914_s26] sm:$0xff]  ;;  %v557_v19 = vld [vmem:[%s914_s26 + $0x8] sm:$0xff]  ;;  %s559_s15 = sadd.s32 1, %s918_s8  ;;  %s549_s14 = sadd.s32 1, %s922_s14   ;;  %s922_s14 = sphi %s920_s14, %s549_s14   ;;  %s918_s8 = sphi %s916_s8, %s917_s8   ;;  %s914_s26 = sphi %s912_s26, %s564_s26   ;;  %s910_s21 = sphi %s908_s21, %s565_s21  }
  0xef   : >> { %556 = vst [vmem:[%s910_s21] sm:$0xff] %v555_v18  ;;  %558 = vst [vmem:[%s910_s21 + $0x8] sm:$0xff] %v557_v19  ;;  %p560_p11 = scmp.ge.s32.totalorder %s559_s15, %s1046_s13  ;;  %p548_p12 = scmp.ge.s32.totalorder %s549_s14, %s1046_s13 }
  0xf1   : >> { %s1087_s15 = smov (%p560_p11, %s559_s15), 0  ;;  %551 = sbr.rel (!%p548_p12) target bundleno = 238 (0xee), region = 133 }
  0xf2   : >> { %s726_s16 = sshll.u32 %s1087_s15, 4  ;;  %s917_s8 = smov %s1087_s15  }
  0xf3   : >> { %s564_s26 = scalar_lea.vmem %s1029_s6, %s726_s16 [#allocation2]   ;;  %s565_s21 = scalar_lea.vmem %s1040_s11, %s726_s16  }
  0xf6 PF: > { %s1056_s17 = sand.u32 1, %s1085_s18   ;;  %s737_s20 = sshll.u32 %s1046_s13, 4 }
  0xf7   : > { %s570_s23 = scalar_lea.vmem %s1029_s6, %s737_s20 [#allocation2]   ;;  %s572_s24 = scalar_lea.vmem %s1040_s11, %s737_s20  }
  0xf8   : > { %p731_p13 = scmp.le.s32.totalorder %s1056_s17, 0 }
  0xf9   : > { %s924_s27 = smov (!%p731_p13), %s572_s24   ;;  %s928_s28 = smov (!%p731_p13), %s570_s23  }
  0xfa   : > { %669 = sbr.rel (%p731_p13) target bundleno = 263 (0x107), region = 138  ;;  %s932_s29 = smov (!%p731_p13), 0  }
  0xfb   : > { %s936_s30 = smov (!%p731_p13), 0  }
  0xff LB: >> { %v582_v20 = vld [vmem:[%s930_s28] sm:$0xff]  ;;  %s584_s18 = sadd.s32 1, %s934_s29  ;;  %s576_s30 = sadd.s32 1, %s938_s30   ;;  %s938_s30 = sphi %s936_s30, %s576_s30   ;;  %s934_s29 = sphi %s932_s29, %s933_s29   ;;  %s930_s28 = sphi %s928_s28, %s589_s28   ;;  %s926_s27 = sphi %s924_s27, %s590_s27  }
 0x100   : >> { %583 = vst [vmem:[%s926_s27] sm:$0xff] %v582_v20  ;;  %p585_p0 = scmp.ge.s32.totalorder %s584_s18, %s1056_s17  ;;  %p575_p1 = scmp.ge.s32.totalorder %s576_s30, %s1056_s17 }
 0x102   : >> { %s1089_s18 = smov (%p585_p0, %s584_s18), 0  ;;  %578 = sbr.rel (!%p575_p1) target bundleno = 255 (0xff), region = 144 }
 0x103   : >> { %s732_s6 = sshll.u32 %s1089_s18, 3  ;;  %s933_s29 = smov %s1089_s18  }
 0x104   : >> { %s589_s28 = scalar_lea.vmem %s570_s23, %s732_s6 [#allocation2]   ;;  %s590_s27 = scalar_lea.vmem %s572_s24, %s732_s6  }
 0x107 PF: > { %p12_p2 = scmp.ge.s32.totalorder %s985_s22, 4   ;;  %s1081_s18 = smov %s902_s19 }
 0x108   : > { %s1082_s19 = smov %s993_s25  ;;  %s1083_s20 = smov %s985_s22 }
 0x109   :  { %14 = sbr.rel (!%p12_p2) target bundleno = 2 (0x2), region = 155 }

</bundles_post_ra>
